<compile_context>
chip_gen: v7x
topology: tpu7x:2x2x1
jax: 0.10.0
libtpu: 0.0.40
codegen_flags: <defaults>
</compile_context>

<pallas_src>
import functools
import jax
import jax.numpy as jnp
from jax import lax
from jax.experimental import pallas as pl
from jax.experimental.pallas import tpu as pltpu


# ----------------------- config (small, consistent with the module) -----------------------
B = 2
INPUT_DIMS = (16, 24)
MM_DIM = 32
CHUNKS = 4
RANK = 3
OUTPUT_DIM = 8


def get_sizes_list(dim, chunks):
    split_size = (dim + chunks - 1) // chunks
    sizes_list = [split_size] * chunks
    sizes_list[-1] = sizes_list[-1] - (sum(sizes_list) - dim)
    assert sum(sizes_list) == dim
    return sizes_list


SIZES = get_sizes_list(MM_DIM, CHUNKS)
assert all(s == SIZES[0] for s in SIZES), "kernel assumes equal chunk sizes"
# TODO(synk): ragged sizes_list (smaller last chunk) would need per-chunk padding; the
#             default Block config (mm_dim=1600, chunks=20) gives equal sizes, so only that
#             case is handled.
SIZE = SIZES[0]
IN_PAD = max(INPUT_DIMS)

# batched matmul: batch dim 0 on both operands, contract lhs last dim with rhs middle dim
_DN_BATCH0 = (((2,), (1,)), ((0,), (0,)))


# ----------------------------------- Pallas kernel ----------------------------------------
def _block_kernel(xs_ref, win_ref, bin_ref, wm_ref, bm_ref, wo_ref, bo_ref, o_ref,
                  *, chunks, size, rank):
    # Activations arrive f32; MXU operands are cast to bf16, accumulation stays f32.
    xs = xs_ref[...].astype(jnp.bfloat16)                         # (2, IN_PAD, BT)

    # ---- input projections: one batch-of-2 full-width matmul (no chunk broadcast) -------
    hh = lax.dot_general(win_ref[...], xs, _DN_BATCH0,
                         preferred_element_type=jnp.float32)       # (2, MM, BT) f32
    hh = hh + bin_ref[...]                                         # bias broadcasts over lanes

    two, mm_dim, bt = hh.shape
    # ---- chunk the hidden along the sublane (feature) axis: (2, C*S, BT) -> (2C, S, BT) --
    hc = hh.reshape(two * chunks, size, bt).astype(jnp.bfloat16)

    # ---- merge projections: one chunk-batched matmul, then the Hadamard merge ------------
    mm = lax.dot_general(wm_ref[...], hc, _DN_BATCH0,
                         preferred_element_type=jnp.float32)       # (2C, R*S, BT) f32
    mm = mm + bm_ref[...]
    m = mm[:chunks] * mm[chunks:]                                  # (C, R*S, BT)

    # ---- rank reduction: rank goes to a leading axis, sum is straight VPU adds -----------
    z = jnp.sum(m.reshape(chunks, rank, size, bt), axis=1)         # (C, S, BT) f32

    # ---- pos_norm == 'before_cat': signed sqrt + per-(chunk, sample) L2 normalize (f32) --
    z = jnp.where(z >= 0.0, 1.0, -1.0) * jnp.sqrt(jnp.abs(z))
    ssq = jnp.sum(z * z, axis=1, keepdims=True)                    # (C, 1, BT)
    z = z * lax.rsqrt(jnp.maximum(ssq, 1e-24))                     # == z / max(||z||_2, 1e-12)

    # ---- output projection with the chunk reduction folded in: one K = mm_dim matmul -----
    zcat = z.reshape(chunks * size, bt).astype(jnp.bfloat16)       # (MM, BT)
    out = jnp.dot(wo_ref[...], zcat,
                  preferred_element_type=jnp.float32) + bo_ref[...]   # (O, BT)
    o_ref[...] = out.astype(o_ref.dtype)


# ------------------------------ host-side packing (one time) ------------------------------
def pack_block_params(params):
    """Init-time weight re-layout + bf16 cast. Keep this out of the per-call path."""
    (w0t, b0, w1t, b1, wm0, bm0, wm1, bm1, woutt, bout) = params
    w0p = jnp.pad(w0t, ((0, IN_PAD - INPUT_DIMS[0]), (0, 0)))              # (IN_PAD, MM)
    w1p = jnp.pad(w1t, ((0, IN_PAD - INPUT_DIMS[1]), (0, 0)))
    win_t = jnp.stack([w0p.T, w1p.T], axis=0).astype(jnp.bfloat16)         # (2, MM, IN_PAD)
    bin_t = jnp.stack([b0.reshape(-1, 1), b1.reshape(-1, 1)], axis=0)      # (2, MM, 1)  f32
    wm = jnp.concatenate([wm0, wm1], axis=0)                               # (2C, S, R*S)
    wm_t = jnp.transpose(wm, (0, 2, 1)).astype(jnp.bfloat16)               # (2C, R*S, S)
    bm_t = jnp.transpose(jnp.concatenate([bm0, bm1], axis=0), (0, 2, 1))   # (2C, R*S, 1) f32
    wo_t = woutt.T.astype(jnp.bfloat16)                                    # (O, MM)
    bo_t = bout.reshape(-1, 1)                                             # (O, 1) f32
    return win_t, bin_t, wm_t, bm_t, wo_t, bo_t


# ------------------------------------ forward wrapper -------------------------------------
def block_forward(x0, x1, packed):
    win_t, bin_t, wm_t, bm_t, wo_t, bo_t = packed
    bsz = x0.shape[0]

    # Per-call input re-layout only (cheap, stays in XLA): pad to a common width, stack the
    # two modalities, put batch on lanes / features on sublanes.
    x0p = jnp.pad(x0, ((0, 0), (0, IN_PAD - INPUT_DIMS[0])))
    x1p = jnp.pad(x1, ((0, 0), (0, IN_PAD - INPUT_DIMS[1])))
    xs_t = jnp.stack([x0p.T, x1p.T], axis=0)                               # (2, IN_PAD, B)

    bt = bsz  # one batch tile at toy sizes (block == full array, so (8,128) rule is satisfied)
    # TODO(synk): production config (mm_dim=1600, chunks=20, rank=15, big batch): use a
    #             128/256-wide batch tile (bt must then be a multiple of 128), pad SIZE (80)
    #             up to 128 sublanes in the packed weights, and set a generation-aware
    #             pltpu.CompilerParams(vmem_limit_bytes=...) (64 MiB physical on v7x vs
    #             128 MiB on v5e/v6e).
    grid = (pl.cdiv(bsz, bt),)

    kernel = functools.partial(_block_kernel, chunks=CHUNKS, size=SIZE, rank=RANK)
    const3 = lambda i: (0, 0, 0)
    const2 = lambda i: (0, 0)
    out_t = pl.pallas_call(
        kernel,
        out_shape=jax.ShapeDtypeStruct((OUTPUT_DIM, bsz), jnp.float32),
        grid=grid,
        in_specs=[
            pl.BlockSpec((2, IN_PAD, bt), lambda i: (0, 0, i)),   # streamed batch tile
            pl.BlockSpec(win_t.shape, const3),                    # weights: constant index
            pl.BlockSpec(bin_t.shape, const3),                    #   maps -> VMEM resident
            pl.BlockSpec(wm_t.shape, const3),
            pl.BlockSpec(bm_t.shape, const3),
            pl.BlockSpec(wo_t.shape, const2),
            pl.BlockSpec(bo_t.shape, const2),
        ],
        out_specs=pl.BlockSpec((OUTPUT_DIM, bt), lambda i: (0, i)),   # lane-dense in batch
        compiler_params=pltpu.CompilerParams(dimension_semantics=("parallel",)),
    )(xs_t, win_t, bin_t, wm_t, bm_t, wo_t, bo_t)
    return out_t.T                                                    # (B, OUTPUT_DIM)


block_forward = jax.jit(block_forward)


# --------------------------------- pure-JAX references -------------------------------------
def block_reference_f32(x0, x1, params):
    """Full-precision reference mirroring the torch module."""
    (w0t, b0, w1t, b1, wm0, bm0, wm1, bm1, woutt, bout) = params
    h0 = x0 @ w0t + b0
    h1 = x1 @ w1t + b1
    zs = []
    for c in range(CHUNKS):
        h0c = h0[:, c * SIZE:(c + 1) * SIZE]
        h1c = h1[:, c * SIZE:(c + 1) * SIZE]
        m = (h0c @ wm0[c] + bm0[c]) * (h1c @ wm1[c] + bm1[c])
        z = m.reshape(x0.shape[0], RANK, SIZE).sum(axis=1)
        z = jnp.sqrt(jnp.maximum(z, 0.0)) - jnp.sqrt(jnp.maximum(-z, 0.0))
        z = z / jnp.maximum(jnp.linalg.norm(z, axis=1, keepdims=True), 1e-12)
        zs.append(z)
    return jnp.concatenate(zs, axis=1) @ woutt + bout


def block_reference_bf16(x0, x1, params):
    """Same math, with the same bf16 MXU-operand quantization the kernel uses."""
    (w0t, b0, w1t, b1, wm0, bm0, wm1, bm1, woutt, bout) = params
    bf, f32 = jnp.bfloat16, jnp.float32
    h0 = jnp.dot(x0.astype(bf), w0t.astype(bf), preferred_element_type=f32) + b0
    h1 = jnp.dot(x1.astype(bf), w1t.astype(bf), preferred_element_type=f32) + b1
    zs = []
    for c in range(CHUNKS):
        h0c = h0[:, c * SIZE:(c + 1) * SIZE]
        h1c = h1[:, c * SIZE:(c + 1) * SIZE]
        m0 = jnp.dot(h0c.astype(bf), wm0[c].astype(bf), preferred_element_type=f32) + bm0[c]
        m1 = jnp.dot(h1c.astype(bf), wm1[c].astype(bf), preferred_element_type=f32) + bm1[c]
        z = (m0 * m1).reshape(x0.shape[0], RANK, SIZE).sum(axis=1)
        z = jnp.where(z >= 0.0, 1.0, -1.0) * jnp.sqrt(jnp.abs(z))
        z = z / jnp.maximum(jnp.linalg.norm(z, axis=1, keepdims=True), 1e-12)
        zs.append(z)
    zcat = jnp.concatenate(zs, axis=1)
    return jnp.dot(zcat.astype(bf), woutt.astype(bf), preferred_element_type=f32) + bout


# --------------------------------------- main ----------------------------------------------
if __name__ == "__main__":
    key = jax.random.PRNGKey(0)
    keys = jax.random.split(key, 12)

    x0 = jax.random.normal(keys[0], (B, INPUT_DIMS[0]), jnp.float32)
    x1 = jax.random.normal(keys[1], (B, INPUT_DIMS[1]), jnp.float32)

    # Deterministic parameter init (shapes follow Block.__init__; stored pre-transposed as
    # (in, out) so y = x @ W_T + b, identical math to torch's x @ W.T + b).
    s = 0.1
    w0t = s * jax.random.normal(keys[2], (INPUT_DIMS[0], MM_DIM), jnp.float32)
    b0 = s * jax.random.normal(keys[3], (1, MM_DIM), jnp.float32)
    w1t = s * jax.random.normal(keys[4], (INPUT_DIMS[1], MM_DIM), jnp.float32)
    b1 = s * jax.random.normal(keys[5], (1, MM_DIM), jnp.float32)
    wm0 = s * jax.random.normal(keys[6], (CHUNKS, SIZE, SIZE * RANK), jnp.float32)
    bm0 = s * jax.random.normal(keys[7], (CHUNKS, 1, SIZE * RANK), jnp.float32)
    wm1 = s * jax.random.normal(keys[8], (CHUNKS, SIZE, SIZE * RANK), jnp.float32)
    bm1 = s * jax.random.normal(keys[9], (CHUNKS, 1, SIZE * RANK), jnp.float32)
    woutt = s * jax.random.normal(keys[10], (MM_DIM, OUTPUT_DIM), jnp.float32)
    bout = s * jax.random.normal(keys[11], (1, OUTPUT_DIM), jnp.float32)

    params = (w0t, b0, w1t, b1, wm0, bm0, wm1, bm1, woutt, bout)
    packed = pack_block_params(params)     # one-time packing, outside the per-call path

    out = block_forward(x0, x1, packed)
    out = jax.block_until_ready(out)
    assert out.shape == (B, OUTPUT_DIM)

    # Tight check against the bf16-quantized reference (tracks the kernel's MXU precision).
    ref_bf16 = block_reference_bf16(x0, x1, params)
    assert jnp.allclose(out, ref_bf16, atol=1e-2, rtol=1e-2), (out, ref_bf16)
    # Loose sanity check against the full-precision module semantics.
    ref_f32 = block_reference_f32(x0, x1, params)
    assert float(jnp.max(jnp.abs(out - ref_f32))) < 0.3, (out, ref_f32)

    print("KERNEL_OK")
</pallas_src>

<mosaic_0001>
module attributes {stable_mosaic.version = 11 : i64} {
  func.func @_block_kernel(%arg0: i32, %arg1: memref<2x24x2xf32, #tpu.memory_space<vmem>>, %arg2: memref<2x32x24xbf16, #tpu.memory_space<vmem>>, %arg3: memref<2x32x1xf32, #tpu.memory_space<vmem>>, %arg4: memref<8x24x8xbf16, #tpu.memory_space<vmem>>, %arg5: memref<8x24x1xf32, #tpu.memory_space<vmem>>, %arg6: memref<8x32xbf16, #tpu.memory_space<vmem>>, %arg7: memref<8x1xf32, #tpu.memory_space<vmem>>, %arg8: memref<8x2xf32, #tpu.memory_space<vmem>>) attributes {dimension_semantics = [#tpu.dimension_semantics<parallel>], iteration_bounds = array<i64: 1>, scalar_prefetch = 0 : i64, scratch_operands = 0 : i64, tpu.core_type = #tpu.core_type<tc>, window_params = [{transform_indices = @transform_0, window_bounds = array<i64: 2, 24, 2>}, {pipeline_mode = #tpu.pipeline_mode<synchronous>, transform_indices = @transform_1, window_bounds = array<i64: 2, 32, 24>}, {pipeline_mode = #tpu.pipeline_mode<synchronous>, transform_indices = @transform_2, window_bounds = array<i64: 2, 32, 1>}, {pipeline_mode = #tpu.pipeline_mode<synchronous>, transform_indices = @transform_3, window_bounds = array<i64: 8, 24, 8>}, {pipeline_mode = #tpu.pipeline_mode<synchronous>, transform_indices = @transform_4, window_bounds = array<i64: 8, 24, 1>}, {pipeline_mode = #tpu.pipeline_mode<synchronous>, transform_indices = @transform_5, window_bounds = array<i64: 8, 32>}, {pipeline_mode = #tpu.pipeline_mode<synchronous>, transform_indices = @transform_6, window_bounds = array<i64: 8, 1>}, {transform_indices = @transform_7, window_bounds = array<i64: 8, 2>}]} {
    %c0 = arith.constant 0 : index
    %c0_0 = arith.constant 0 : index
    %c0_1 = arith.constant 0 : index
    %0 = vector.load %arg1[%c0, %c0_0, %c0_1] : memref<2x24x2xf32, #tpu.memory_space<vmem>>, vector<2x24x2xf32>
    %1 = arith.truncf %0 : vector<2x24x2xf32> to vector<2x24x2xbf16>
    %c0_2 = arith.constant 0 : index
    %c0_3 = arith.constant 0 : index
    %c0_4 = arith.constant 0 : index
    %2 = vector.load %arg2[%c0_2, %c0_3, %c0_4] : memref<2x32x24xbf16, #tpu.memory_space<vmem>>, vector<2x32x24xbf16>
    %cst = arith.constant dense<0.000000e+00> : vector<2x32x2xf32>
    %3 = tpu.matmul %2, %1, %cst {dimension_numbers = #tpu.dot_dimension_numbers<[2], [1], [1], [2], [0, 0, 0, 1, 1, 2], [0], [0]>} : vector<2x32x24xbf16>, vector<2x24x2xbf16>, vector<2x32x2xf32> -> vector<2x32x2xf32>
    %c0_5 = arith.constant 0 : index
    %c0_6 = arith.constant 0 : index
    %c0_7 = arith.constant 0 : index
    %4 = vector.load %arg3[%c0_5, %c0_6, %c0_7] : memref<2x32x1xf32, #tpu.memory_space<vmem>>, vector<2x32x1xf32>
    %5 = vector.broadcast %4 : vector<2x32x1xf32> to vector<2x32x2xf32>
    %6 = arith.addf %3, %5 : vector<2x32x2xf32>
    %7 = vector.shape_cast %6 : vector<2x32x2xf32> to vector<8x8x2xf32>
    %8 = arith.truncf %7 : vector<8x8x2xf32> to vector<8x8x2xbf16>
    %c0_8 = arith.constant 0 : index
    %c0_9 = arith.constant 0 : index
    %c0_10 = arith.constant 0 : index
    %9 = vector.load %arg4[%c0_8, %c0_9, %c0_10] : memref<8x24x8xbf16, #tpu.memory_space<vmem>>, vector<8x24x8xbf16>
    %cst_11 = arith.constant dense<0.000000e+00> : vector<8x24x2xf32>
    %10 = tpu.matmul %9, %8, %cst_11 {dimension_numbers = #tpu.dot_dimension_numbers<[2], [1], [1], [2], [0, 0, 0, 1, 1, 2], [0], [0]>} : vector<8x24x8xbf16>, vector<8x8x2xbf16>, vector<8x24x2xf32> -> vector<8x24x2xf32>
    %c0_12 = arith.constant 0 : index
    %c0_13 = arith.constant 0 : index
    %c0_14 = arith.constant 0 : index
    %11 = vector.load %arg5[%c0_12, %c0_13, %c0_14] : memref<8x24x1xf32, #tpu.memory_space<vmem>>, vector<8x24x1xf32>
    %12 = vector.broadcast %11 : vector<8x24x1xf32> to vector<8x24x2xf32>
    %13 = arith.addf %10, %12 : vector<8x24x2xf32>
    %14 = vector.extract_strided_slice %13 {offsets = [0, 0, 0], sizes = [4, 24, 2], strides = [1, 1, 1]} : vector<8x24x2xf32> to vector<4x24x2xf32>
    %15 = vector.extract_strided_slice %13 {offsets = [4, 0, 0], sizes = [4, 24, 2], strides = [1, 1, 1]} : vector<8x24x2xf32> to vector<4x24x2xf32>
    %16 = arith.mulf %14, %15 : vector<4x24x2xf32>
    %17 = vector.shape_cast %16 : vector<4x24x2xf32> to vector<4x3x8x2xf32>
    %cst_15 = arith.constant dense<0.000000e+00> : vector<4x8x2xf32>
    %18 = vector.multi_reduction <add>, %17, %cst_15 [1] : vector<4x3x8x2xf32> to vector<4x8x2xf32>
    %cst_16 = arith.constant 0.000000e+00 : f32
    %19 = vector.broadcast %cst_16 : f32 to vector<4x8x2xf32>
    %20 = arith.cmpf oge, %18, %19 : vector<4x8x2xf32>
    %cst_17 = arith.constant 1.000000e+00 : f32
    %cst_18 = arith.constant -1.000000e+00 : f32
    %21 = vector.broadcast %cst_17 : f32 to vector<4x8x2xf32>
    %22 = vector.broadcast %cst_18 : f32 to vector<4x8x2xf32>
    %23 = arith.select %20, %21, %22 : vector<4x8x2xi1>, vector<4x8x2xf32>
    %24 = math.absf %18 : vector<4x8x2xf32>
    %25 = math.sqrt %24 : vector<4x8x2xf32>
    %26 = arith.mulf %23, %25 : vector<4x8x2xf32>
    %27 = arith.mulf %26, %26 : vector<4x8x2xf32>
    %cst_19 = arith.constant dense<0.000000e+00> : vector<4x2xf32>
    %28 = vector.multi_reduction <add>, %27, %cst_19 [1] : vector<4x8x2xf32> to vector<4x2xf32>
    %29 = vector.shape_cast %28 : vector<4x2xf32> to vector<4x1x2xf32>
    %cst_20 = arith.constant 1.000000e-24 : f32
    %30 = vector.broadcast %cst_20 : f32 to vector<4x1x2xf32>
    %31 = arith.maximumf %29, %30 : vector<4x1x2xf32>
    %32 = math.rsqrt %31 : vector<4x1x2xf32>
    %33 = vector.broadcast %32 : vector<4x1x2xf32> to vector<4x8x2xf32>
    %34 = arith.mulf %26, %33 : vector<4x8x2xf32>
    %35 = vector.shape_cast %34 : vector<4x8x2xf32> to vector<32x2xf32>
    %36 = arith.truncf %35 : vector<32x2xf32> to vector<32x2xbf16>
    %c0_21 = arith.constant 0 : index
    %c0_22 = arith.constant 0 : index
    %37 = vector.load %arg6[%c0_21, %c0_22] : memref<8x32xbf16, #tpu.memory_space<vmem>>, vector<8x32xbf16>
    %cst_23 = arith.constant dense<0.000000e+00> : vector<8x2xf32>
    %38 = tpu.matmul %37, %36, %cst_23 {dimension_numbers = #tpu.dot_dimension_numbers<[1], [0], [0], [1], [0, 0, 1, 1], [], []>} : vector<8x32xbf16>, vector<32x2xbf16>, vector<8x2xf32> -> vector<8x2xf32>
    %c0_24 = arith.constant 0 : index
    %c0_25 = arith.constant 0 : index
    %39 = vector.load %arg7[%c0_24, %c0_25] : memref<8x1xf32, #tpu.memory_space<vmem>>, vector<8x1xf32>
    %40 = vector.broadcast %39 : vector<8x1xf32> to vector<8x2xf32>
    %41 = arith.addf %38, %40 : vector<8x2xf32>
    %c0_26 = arith.constant 0 : index
    %c0_27 = arith.constant 0 : index
    %42 = vector.load %arg8[%c0_26, %c0_27] : memref<8x2xf32, #tpu.memory_space<vmem>>, vector<8x2xf32>
    tpu.vector_store %arg8[%c0_26, %c0_27], %41 {strides = array<i32>} : memref<8x2xf32, #tpu.memory_space<vmem>>, vector<8x2xf32>,
    return
  }
  func.func @transform_0(%arg0: i32) -> (i32, i32, i32) {
    %c0_i32 = arith.constant 0 : i32
    %c0_i32_0 = arith.constant 0 : i32
    %c0_i32_1 = arith.constant 0 : i32
    return %c0_i32, %c0_i32_0, %arg0 : i32, i32, i32
  }
  func.func @transform_1(%arg0: i32) -> (i32, i32, i32) {
    %c0_i32 = arith.constant 0 : i32
    %c0_i32_0 = arith.constant 0 : i32
    %c0_i32_1 = arith.constant 0 : i32
    %c0_i32_2 = arith.constant 0 : i32
    return %c0_i32, %c0_i32_0, %c0_i32_1 : i32, i32, i32
  }
  func.func @transform_2(%arg0: i32) -> (i32, i32, i32) {
    %c0_i32 = arith.constant 0 : i32
    %c0_i32_0 = arith.constant 0 : i32
    %c0_i32_1 = arith.constant 0 : i32
    %c0_i32_2 = arith.constant 0 : i32
    return %c0_i32, %c0_i32_0, %c0_i32_1 : i32, i32, i32
  }
  func.func @transform_3(%arg0: i32) -> (i32, i32, i32) {
    %c0_i32 = arith.constant 0 : i32
    %c0_i32_0 = arith.constant 0 : i32
    %c0_i32_1 = arith.constant 0 : i32
    %c0_i32_2 = arith.constant 0 : i32
    return %c0_i32, %c0_i32_0, %c0_i32_1 : i32, i32, i32
  }
  func.func @transform_4(%arg0: i32) -> (i32, i32, i32) {
    %c0_i32 = arith.constant 0 : i32
    %c0_i32_0 = arith.constant 0 : i32
    %c0_i32_1 = arith.constant 0 : i32
    %c0_i32_2 = arith.constant 0 : i32
    return %c0_i32, %c0_i32_0, %c0_i32_1 : i32, i32, i32
  }
  func.func @transform_5(%arg0: i32) -> (i32, i32) {
    %c0_i32 = arith.constant 0 : i32
    %c0_i32_0 = arith.constant 0 : i32
    %c0_i32_1 = arith.constant 0 : i32
    return %c0_i32, %c0_i32_0 : i32, i32
  }
  func.func @transform_6(%arg0: i32) -> (i32, i32) {
    %c0_i32 = arith.constant 0 : i32
    %c0_i32_0 = arith.constant 0 : i32
    %c0_i32_1 = arith.constant 0 : i32
    return %c0_i32, %c0_i32_0 : i32, i32
  }
  func.func @transform_7(%arg0: i32) -> (i32, i32) {
    %c0_i32 = arith.constant 0 : i32
    %c0_i32_0 = arith.constant 0 : i32
    return %c0_i32, %arg0 : i32, i32
  }
}

</mosaic_0001>

<bundles_post_ra>
// kernel: block_forward.1
= control target key start
LH: loop header
LB: loop body
LE: loop exit
PB: predicated region body
PF: predicated region fallthrough
CT: control target
= control target key end

     0   :  { %v1307_v3 = vmov 0   ;;  %vm110_vm0 = vcmask 1043456   ;;  %vm103_vm1 = vcmask 195584   ;;  %vm415_vm2 = vcmask 64512   ;;  %s1625_s0 = inlined_call_operand.vmem [shape: f32[2,24,2], index: 0, kind: input, shape index: {}]   ;;  %s1626_s1 = inlined_call_operand.vmem [shape: bf16[2,32,24], index: 1, kind: input, shape index: {}]   ;;  %s1627_s2 = inlined_call_operand.vmem [shape: f32[2,32,1], index: 2, kind: input, shape index: {}]   ;;  %s1628_s4 = inlined_call_operand.vmem [shape: f32[8,24,1], index: 4, kind: input, shape index: {}]   ;;  %s1629_s6 = inlined_call_operand.vmem [shape: f32[8,1], index: 6, kind: input, shape index: {}]   ;;  %s1630_s3 = inlined_call_operand.vmem [shape: bf16[8,24,8], index: 3, kind: input, shape index: {}]   ;;  %s1631_s5 = inlined_call_operand.vmem [shape: bf16[8,32], index: 5, kind: input, shape index: {}]   ;;  %s1632_s7 = inlined_call_operand.vmem [shape: f32[8,2], index: 7, kind: output, shape index: {}]  }
   0x1   :  { %v27_v0 = vld [vmem:[%s1625_s0] sm:$0xff]  ;;  %v28_v1 = vld [vmem:[%s1625_s0 + $0x8] sm:$0xff]  ;;  %v30_v2 = vld [vmem:[%s1625_s0 + $0x18] sm:$0xff]  ;;  %1269 = vset.pattern.permute.xlu0 %v1307_v3  ;;  %1270 = vset.pattern.permute.xlu1 %v1307_v3  ;;  %vm1309_vm3 = vmmov 0   ;;  %vm940_vm4 = vcmask 15360  }
   0x2   :  { %v33_v4 = vpack.c.bf16 %v28_v1, %v27_v0  ;;  %v31_v5 = vld [vmem:[%s1625_s0 + $0x20] sm:$0xff]  ;;  %v29_v6 = vld [vmem:[%s1625_s0 + $0x10] sm:$0xff]  ;;  %v32_v7 = vld [vmem:[%s1625_s0 + $0x28] sm:$0xff] }
   0x3   :  { %v35_v8 = vpack.c.bf16 %v31_v5, %v30_v2  ;;  %v34_v9 = vpack.c.bf16 %v29_v6, %v29_v6  ;;  %v36_v10 = vpack.c.bf16 %v32_v7, %v32_v7  ;;  %v1271_v11 = vld [vmem:[%s1626_s1] sm:$0xff]   ;;  %v1272_v12 = vld [vmem:[%s1626_s1 + $0x10] sm:$0xff]   ;;  %v1273_v16 = vld [vmem:[%s1626_s1 + $0x8] sm:$0xff]  }
   0x4   :  { %1183 = vmatprep.subr.bf16.mxu0 %v33_v4  ;;  %1187 = vmatprep.mubr.msk.bf16.mxu0 %vm103_vm1, %v1271_v11  ;;  %v45_v15 = vld [vmem:[%s1627_s2] sm:$0xff]  ;;  %v47_v17 = vld [vmem:[%s1627_s2 + $0x10] sm:$0xff]  ;;  %v1274_v18 = vld [vmem:[%s1626_s1 + $0x18] sm:$0xff]  }
   0x5   :  { %1191 = vmatprep.subr.bf16.mxu1 %v35_v8  ;;  %1184 = vmatpush3.bf16.msra.mxu0 %v33_v4  ;;  %v112_v13 = vsel %vm110_vm0, %v34_v9, 0  ;;  %v180_v14 = vsel %vm110_vm0, %v36_v10, 0  ;;  %v46_v19 = vld [vmem:[%s1627_s2 + $0x8] sm:$0xff]  ;;  %v48_v20 = vld [vmem:[%s1627_s2 + $0x18] sm:$0xff]  ;;  %v49_v21 = vld [vmem:[%s1627_s2 + $0x20] sm:$0xff] }
   0x6   :  { %1192 = vmatpush3.bf16.msra.mxu1 %v35_v8  ;;  %1255 = vmatprep.subr.msk.bf16.mxu0 %vm110_vm0, %v34_v9  ;;  %v50_v22 = vld [vmem:[%s1627_s2 + $0x28] sm:$0xff]  ;;  %v51_v23 = vld [vmem:[%s1627_s2 + $0x30] sm:$0xff]  ;;  %v52_v24 = vld [vmem:[%s1627_s2 + $0x38] sm:$0xff] }
   0x7   :  { %1256 = vmatprep.subr.msk.bf16.mxu1 %vm110_vm0, %v36_v10  ;;  %1195 = vmatprep.mubr.msk.bf16.mxu1 %vm103_vm1, %v1272_v12  ;;  %v263_v25 = vld [vmem:[%s1628_s4] sm:$0xff]  ;;  %v264_v26 = vld [vmem:[%s1628_s4 + $0x8] sm:$0xff]  ;;  %v266_v27 = vld [vmem:[%s1628_s4 + $0x18] sm:$0xff] }
   0x8   :  { %55 = vperm.xlu0 %1269, %v45_v15   ;;  %65 = vperm.xlu1 %1270, %v47_v17   ;;  %v267_v28 = vld [vmem:[%s1628_s4 + $0x20] sm:$0xff]  ;;  %v276_v30 = vld [vmem:[%s1628_s4 + $0x68] sm:$0xff]  ;;  %v278_v31 = vld [vmem:[%s1628_s4 + $0x78] sm:$0xff] }
   0x9   :  { %1186 = vmatpush3.bf16.msra.mxu0 %v112_v13  ;;  %v275_v29 = vld [vmem:[%s1628_s4 + $0x60] sm:$0xff]  ;;  %v265_v33 = vld [vmem:[%s1628_s4 + $0x10] sm:$0xff]  ;;  %v268_v34 = vld [vmem:[%s1628_s4 + $0x28] sm:$0xff] }
   0xa   :  { %1194 = vmatpush3.bf16.msra.mxu1 %v180_v14  ;;  %v279_v32 = vld [vmem:[%s1628_s4 + $0x80] sm:$0xff]  ;;  %v277_v35 = vld [vmem:[%s1628_s4 + $0x70] sm:$0xff]  ;;  %v280_v36 = vld [vmem:[%s1628_s4 + $0x88] sm:$0xff] }
   0xb   :  { %v269_v37 = vld [vmem:[%s1628_s4 + $0x30] sm:$0xff]  ;;  %v270_v38 = vld [vmem:[%s1628_s4 + $0x38] sm:$0xff]  ;;  %v272_v39 = vld [vmem:[%s1628_s4 + $0x48] sm:$0xff] }
   0xc   :  { %1188 = vmatmul.mubr.msk.bf16.vlgmr.msra.gmra.mrb[0].mxu0 %vm103_vm1, %v1273_v16  ;;  %60 = vperm.xlu0 %1269, %v46_v19   ;;  %v273_v40 = vld [vmem:[%s1628_s4 + $0x50] sm:$0xff]  ;;  %v282_v42 = vld [vmem:[%s1628_s4 + $0x98] sm:$0xff]  ;;  %v284_v43 = vld [vmem:[%s1628_s4 + $0xa8] sm:$0xff] }
   0xd   :  { %1196 = vmatmul.mubr.msk.bf16.vlgmr.msra.gmra.mrb[0].mxu1 %vm103_vm1, %v1274_v18  ;;  %70 = vperm.xlu1 %1270, %v48_v20   ;;  %v281_v41 = vld [vmem:[%s1628_s4 + $0x90] sm:$0xff]  ;;  %v271_v45 = vld [vmem:[%s1628_s4 + $0x40] sm:$0xff]  ;;  %v274_v46 = vld [vmem:[%s1628_s4 + $0x58] sm:$0xff]  ;;  %vm1058_vm1 = vcmask 261120  }
   0xe   :  { %v285_v44 = vld [vmem:[%s1628_s4 + $0xb0] sm:$0xff]  ;;  %v283_v47 = vld [vmem:[%s1628_s4 + $0xa0] sm:$0xff]  ;;  %v286_v48 = vld [vmem:[%s1628_s4 + $0xb8] sm:$0xff] }
   0xf   :  { %v1052_v49 = vld [vmem:[%s1629_s6] sm:$0xff]  ;;  %v1277_v51 = vld [vmem:[%s1630_s3 + $0xc] sm:$0xff]   ;;  %v1276_v10 = vld [vmem:[%s1630_s3 + $0x8] ss:$0 sps:$4 sm:$0xff]  }
  0x10   :  { %75 = vperm.xlu0 %1269, %v49_v21   ;;  %v1275_v50 = vld [vmem:[%s1630_s3] sm:$0xff]   ;;  %1207 = vmatprep.mubr.msk.bf16.mxu1 %vm415_vm2, %v1277_v51  ;;  %v1279_v12 = vld [vmem:[%s1630_s3 + $0x18] sm:$0xff]   ;;  %v1278_v16 = vld [vmem:[%s1630_s3 + $0x14] ss:$0 sps:$4 sm:$0xff]  }
  0x11   :  { %80 = vperm.xlu1 %1270, %v50_v22   ;;  %1201 = vmatprep.mubr.msk.bf16.mxu0 %vm415_vm2, %v1275_v50  ;;  %v1281_v17 = vld [vmem:[%s1630_s3 + $0x24] sm:$0xff]  }
  0x14   :  { %85 = vperm.xlu0 %1269, %v51_v23  }
  0x15   :  { %90 = vperm.xlu1 %1270, %v52_v24   ;;  %v1280_v24 = vld [vmem:[%s1630_s3 + $0x20] ss:$0 sps:$4 sm:$0xff]  }
  0x18   :  { %289 = vperm.xlu0 %1269, %v263_v25  }
  0x19   :  { %294 = vperm.xlu1 %1270, %v264_v26   ;;  %v1283_v26 = vld [vmem:[%s1630_s3 + $0x30] sm:$0xff]  }
  0x1c   :  { %304 = vperm.xlu0 %1269, %v266_v27  }
  0x1d   :  { %309 = vperm.xlu1 %1270, %v267_v28   ;;  %v1282_v28 = vld [vmem:[%s1630_s3 + $0x2c] ss:$0 sps:$4 sm:$0xff]  }
  0x20   :  { %349 = vperm.xlu0 %1269, %v275_v29   ;;  %v1285_v29 = vld [vmem:[%s1630_s3 + $0x3c] sm:$0xff]  }
  0x21   :  { %354 = vperm.xlu1 %1270, %v276_v30  }
  0x24   :  { %364 = vperm.xlu0 %1269, %v278_v31  }
  0x25   :  { %369 = vperm.xlu1 %1270, %v279_v32  }
  0x28   :  { %299 = vperm.xlu0 %1269, %v265_v33  }
  0x29   :  { %314 = vperm.xlu1 %1270, %v268_v34   ;;  %v1284_v34 = vld [vmem:[%s1630_s3 + $0x38] ss:$0 sps:$4 sm:$0xff]  }
  0x2c   :  { %359 = vperm.xlu0 %1269, %v277_v35   ;;  %v1287_v35 = vld [vmem:[%s1630_s3 + $0x48] sm:$0xff]  }
  0x2d   :  { %374 = vperm.xlu1 %1270, %v280_v36   ;;  %v1286_v36 = vld [vmem:[%s1630_s3 + $0x44] ss:$0 sps:$4 sm:$0xff]  }
  0x30   :  { %319 = vperm.xlu0 %1269, %v269_v37   ;;  %v1289_v37 = vld [vmem:[%s1630_s3 + $0x54] sm:$0xff]  }
  0x31   :  { %324 = vperm.xlu1 %1270, %v270_v38  }
  0x34   :  { %334 = vperm.xlu0 %1269, %v272_v39  }
  0x35   :  { %339 = vperm.xlu1 %1270, %v273_v40   ;;  %v1288_v40 = vld [vmem:[%s1630_s3 + $0x50] ss:$0 sps:$4 sm:$0xff]  }
  0x38   :  { %379 = vperm.xlu0 %1269, %v281_v41   ;;  %v1290_v41 = vld [vmem:[%s1630_s3 + $0x5c] ss:$0 sps:$4 sm:$0xff]  }
  0x39   :  { %384 = vperm.xlu1 %1270, %v282_v42   ;;  %v1308_v42 = vmov 0.0  }
  0x3c   :  { %394 = vperm.xlu0 %1269, %v284_v43  }
  0x3d   :  { %399 = vperm.xlu1 %1270, %v285_v44  }
  0x40   :  { %329 = vperm.xlu0 %1269, %v271_v45  }
  0x41   :  { %344 = vperm.xlu1 %1270, %v274_v46  }
  0x44   :  { %389 = vperm.xlu0 %1269, %v283_v47  }
  0x45   :  { %404 = vperm.xlu1 %1270, %v286_v48  }
  0x48   :  { %1055 = vperm.xlu0 %1269, %v1052_v49  }
  0x87   :  { %v56_v52 = vpop.permute.xlu0 %55  ;;  %v66_v53 = vpop.permute.xlu1 %65 }
  0x8b   :  { %v61_v54 = vpop.permute.xlu0 %60 }
  0x8c   :  { %v71_v55 = vpop.permute.xlu1 %70 }
  0x8f   :  { %v76_v5 = vpop.permute.xlu0 %75 }
  0x90   :  { %v81_v11 = vpop.permute.xlu1 %80 }
  0x93   :  { %v86_v22 = vpop.permute.xlu0 %85 }
  0x94   :  { %v91_v25 = vpop.permute.xlu1 %90 }
  0x97   :  { %v290_v43 = vpop.permute.xlu0 %289 }
  0x98   :  { %v295_v44 = vpop.permute.xlu1 %294 }
  0x9b   :  { %v305_v45 = vpop.permute.xlu0 %304 }
  0x9c   :  { %v310_v46 = vpop.permute.xlu1 %309 }
  0x9f   :  { %v350_v47 = vpop.permute.xlu0 %349 }
  0xa0   :  { %v355_v48 = vpop.permute.xlu1 %354 }
  0xa3   :  { %v365_v49 = vpop.permute.xlu0 %364 }
  0xa4   :  { %v370_v50 = vpop.permute.xlu1 %369 }
  0xa7   :  { %v300_v51 = vpop.permute.xlu0 %299 }
  0xdf   :  { %v1189_v56 = vpop.f32.mrb[0].mxu0 }
  0xe0   :  { %v1197_v57 = vpop.f32.mrb[0].mxu1  ;;  %v148_v58 = vpop.f32.mrb[1].mxu0  ;;  %v157_v59 = vadd.f32 %v1189_v56, %v66_v53 }
  0xe1   :  { %v149_v60 = vadd.f32 %v148_v58, %v56_v52  ;;  %v216_v61 = vpop.f32.mrb[1].mxu1  ;;  %v1190_v62 = vpop.f32.mrb[2].mxu0  ;;  %v225_v23 = vadd.f32 %v1197_v57, %v86_v22 }
  0xe2   :  { %v151_v63 = vpop.f32.mrb[3].mxu0  ;;  %v1198_v0 = vpop.f32.mrb[2].mxu1  ;;  %v160_v2 = vadd.f32 %v1190_v62, %v71_v55  ;;  %v233_v6 = vpack.c.bf16 %v157_v59, %v157_v59  ;;  %v217_v8 = vadd.f32 %v216_v61, %v76_v5 }
  0xe3   :  { %v231_v1 = vpack.c.bf16 %v149_v60, %v149_v60  ;;  %v152_v3 = vadd.f32 %v151_v63, %v61_v54  ;;  %v219_v4 = vpop.f32.mrb[3].mxu1  ;;  %v228_v27 = vadd.f32 %v1198_v0, %v91_v25  ;;  %v237_v30 = vpack.c.bf16 %v225_v23, %v225_v23  ;;  %v315_v52 = vpop.permute.xlu1 %314 }
  0xe4   :  { %v234_v13 = vpack.c.bf16 %v160_v2, %v160_v2  ;;  %v220_v15 = vadd.f32 %v219_v4, %v81_v11  ;;  %v553_v18 = vsel %vm110_vm0, %v233_v6, 0  ;;  %v235_v19 = vpack.c.bf16 %v217_v8, %v217_v8  ;;  %v360_v53 = vpop.permute.xlu0 %359 }
  0xe5   :  { %v423_v7 = vsel %vm110_vm0, %v231_v1, 0  ;;  %v232_v9 = vpack.c.bf16 %v152_v3, %v152_v3  ;;  %1257 = vmatprep.subr.msk.bf16.mxu0 %vm110_vm0, %v231_v1  ;;  %v238_v32 = vpack.c.bf16 %v228_v27, %v228_v27  ;;  %v813_v38 = vsel %vm110_vm0, %v237_v30, 0 }
  0xe6   :  { %1200 = vmatpush3.bf16.msra.mxu0 %v423_v7  ;;  %v618_v20 = vsel %vm110_vm0, %v234_v13, 0  ;;  %v236_v21 = vpack.c.bf16 %v220_v15, %v220_v15  ;;  %v683_v31 = vsel %vm110_vm0, %v235_v19, 0 }
  0xe7   :  { %v488_v14 = vsel %vm110_vm0, %v232_v9, 0  ;;  %1258 = vmatprep.subr.msk.bf16.mxu1 %vm110_vm0, %v232_v9  ;;  %1259 = vmatprep.subr.msk.bf16.mxu0 %vm110_vm0, %v233_v6  ;;  %v878_v39 = vsel %vm110_vm0, %v238_v32, 0  ;;  %v375_v54 = vpop.permute.xlu1 %374 }
  0xe8   :  { %1206 = vmatpush3.bf16.msra.mxu1 %v488_v14  ;;  %v748_v33 = vsel %vm110_vm0, %v236_v21, 0  ;;  %v320_v55 = vpop.permute.xlu0 %319 }
  0xe9   :  { %1202 = vmatmul.mubr.msk.bf16.vlgmr.msra.gmra.mrb[4].mxu0 %vm415_vm2, %v1276_v10  ;;  %1260 = vmatprep.subr.msk.bf16.mxu1 %vm110_vm0, %v234_v13 }
  0xea   :  { %1212 = vmatpush3.bf16.msra.mxu0 %v553_v18  ;;  %1213 = vmatprep.mubr.msk.bf16.mxu0 %vm415_vm2, %v1279_v12 }
  0xeb   :  { %1208 = vmatmul.mubr.msk.bf16.vlgmr.msra.gmra.mrb[4].mxu1 %vm415_vm2, %v1278_v16  ;;  %1261 = vmatprep.subr.msk.bf16.mxu0 %vm110_vm0, %v235_v19  ;;  %v325_v56 = vpop.permute.xlu1 %324 }
  0xec   :  { %1218 = vmatpush3.bf16.msra.mxu1 %v618_v20  ;;  %1219 = vmatprep.mubr.msk.bf16.mxu1 %vm415_vm2, %v1281_v17  ;;  %v1570_v57 = vpop.permute.xlu0 %334 }
  0xed   :  { %1262 = vmatprep.subr.msk.bf16.mxu1 %vm110_vm0, %v236_v21 }
  0xef   :  { %v1572_v58 = vpop.permute.xlu1 %339 }
  0xf0   :  { %v1574_v59 = vpop.permute.xlu0 %379 }
  0xf1   :  { %1214 = vmatmul.mubr.msk.bf16.vlgmr.msra.gmra.mrb[8].mxu0 %vm415_vm2, %v1280_v24 }
  0xf2   :  { %1224 = vmatpush3.bf16.msra.mxu0 %v683_v31  ;;  %1225 = vmatprep.mubr.msk.bf16.mxu0 %vm415_vm2, %v1283_v26 }
  0xf3   :  { %1263 = vmatprep.subr.msk.bf16.mxu0 %vm110_vm0, %v237_v30  ;;  %1220 = vmatmul.mubr.msk.bf16.vlgmr.msra.gmra.mrb[8].mxu1 %vm415_vm2, %v1282_v28  ;;  %v1576_v61 = vpop.permute.xlu1 %384 }
  0xf4   :  { %1230 = vmatpush3.bf16.msra.mxu1 %v748_v33  ;;  %1231 = vmatprep.mubr.msk.bf16.mxu1 %vm415_vm2, %v1285_v29  ;;  %v1578_v5 = vpop.permute.xlu0 %394 }
  0xf5   :  { %1264 = vmatprep.subr.msk.bf16.mxu1 %vm110_vm0, %v238_v32 }
  0xf7   :  { %v1580_v7 = vpop.permute.xlu1 %399 }
  0xf8   :  { %v330_v15 = vpop.permute.xlu0 %329 }
  0xf9   :  { %1226 = vmatmul.mubr.msk.bf16.vlgmr.msra.gmra.mrb[12].mxu0 %vm415_vm2, %v1284_v34 }
  0xfa   :  { %1236 = vmatpush3.bf16.msra.mxu0 %v813_v38  ;;  %1237 = vmatprep.mubr.msk.bf16.mxu0 %vm415_vm2, %v1287_v35 }
  0xfb   :  { %1232 = vmatmul.mubr.msk.bf16.vlgmr.msra.gmra.mrb[12].mxu1 %vm415_vm2, %v1286_v36  ;;  %1247 = vmatprep.subr.bf16.mxu0 %v1308_v42  ;;  %v345_v17 = vpop.permute.xlu1 %344 }
  0xfc   :  { %1242 = vmatpush3.bf16.msra.mxu1 %v878_v39  ;;  %1243 = vmatprep.mubr.msk.bf16.mxu1 %vm415_vm2, %v1289_v37 }
 0x101   :  { %1238 = vmatmul.mubr.msk.bf16.vlgmr.msra.gmra.mrb[16].mxu0 %vm415_vm2, %v1288_v40 }
 0x102   :  { %1251 = vmatprep.mubr.msk.bf16.mxu0 %vm1309_vm3, %v1308_v42 }
 0x103   :  { %1244 = vmatmul.mubr.msk.bf16.vlgmr.msra.gmra.mrb[16].mxu1 %vm415_vm2, %v1290_v41 }
 0x1bc   :  { %v1203_v60 = vpop.f32.mrb[4].mxu0 }
 0x1bd   :  { %v459_v62 = vpop.f32.mrb[5].mxu0  ;;  %v468_v18 = vadd.f32 %v1203_v60, %v300_v51 }
 0x1be   :  { %v1204_v63 = vpop.f32.mrb[6].mxu0  ;;  %v1209_v0 = vpop.f32.mrb[4].mxu1  ;;  %v460_v21 = vadd.f32 %v459_v62, %v290_v43 }
 0x1bf   :  { %v462_v1 = vpop.f32.mrb[7].mxu0  ;;  %v524_v2 = vpop.f32.mrb[5].mxu1  ;;  %v533_v25 = vadd.f32 %v1209_v0, %v315_v52 }
 0x1c0   :  { %v1210_v3 = vpop.f32.mrb[6].mxu1  ;;  %v463_v26 = vadd.f32 %v462_v1, %v295_v44  ;;  %v525_v31 = vadd.f32 %v524_v2, %v305_v45 }
 0x1c1   :  { %v527_v4 = vpop.f32.mrb[7].mxu1 }
 0x1c2   :  { %v528_v38 = vadd.f32 %v527_v4, %v310_v46 }
 0x1c4   :  { %v1215_v6 = vpop.f32.mrb[8].mxu0 }
 0x1c5   :  { %v589_v8 = vpop.f32.mrb[9].mxu0  ;;  %v598_v43 = vadd.f32 %v1215_v6, %v330_v15 }
 0x1c6   :  { %v1216_v9 = vpop.f32.mrb[10].mxu0  ;;  %v1221_v10 = vpop.f32.mrb[8].mxu1  ;;  %v590_v51 = vadd.f32 %v589_v8, %v320_v55 }
 0x1c7   :  { %v592_v11 = vpop.f32.mrb[11].mxu0  ;;  %v654_v12 = vpop.f32.mrb[9].mxu1 }
 0x1c8   :  { %v1222_v13 = vpop.f32.mrb[10].mxu1 }
 0x1c9   :  { %v1582_v14 = vpop.f32.mrb[11].mxu1 }
 0x1cc   :  { %v1227_v16 = vpop.f32.mrb[12].mxu0 }
 0x1cd   :  { %v728_v19 = vadd.f32 %v1227_v16, %v360_v53  ;;  %v719_v20 = vpop.f32.mrb[13].mxu0 }
 0x1ce   :  { %v720_v22 = vadd.f32 %v719_v20, %v350_v47  ;;  %v1228_v23 = vpop.f32.mrb[14].mxu0  ;;  %v1233_v24 = vpop.f32.mrb[12].mxu1 }
 0x1cf   :  { %v930_v27 = vmul.f32 %v728_v19, %v468_v18  ;;  %v793_v28 = vadd.f32 %v1233_v24, %v375_v54  ;;  %v722_v29 = vpop.f32.mrb[15].mxu0  ;;  %v784_v30 = vpop.f32.mrb[13].mxu1  ;;  %v658_v24 = vadd.f32 %v1582_v14, %v1572_v58 }
 0x1d0   :  { %v928_v32 = vmul.f32 %v720_v22, %v460_v21  ;;  %v723_v33 = vadd.f32 %v722_v29, %v355_v48  ;;  %v785_v34 = vadd.f32 %v784_v30, %v365_v49  ;;  %v1234_v35 = vpop.f32.mrb[14].mxu1  ;;  %v390_v47 = vpop.permute.xlu0 %389  ;;  %v663_v48 = vadd.f32 %v1221_v10, %v345_v17 }
 0x1d1   :  { %v933_v36 = vmul.f32 %v793_v28, %v533_v25  ;;  %v787_v37 = vpop.f32.mrb[15].mxu1  ;;  %v405_v54 = vpop.permute.xlu1 %404  ;;  %v593_v49 = vadd.f32 %v592_v11, %v325_v56  ;;  %v944_v46 = vsel %vm940_vm4, %v930_v27, 0.0  ;;  %v655_v17 = vadd.f32 %v654_v12, %v1570_v57 }
 0x1d2   :  { %v929_v39 = vmul.f32 %v723_v33, %v463_v26  ;;  %v931_v40 = vmul.f32 %v785_v34, %v525_v31  ;;  %v788_v41 = vadd.f32 %v787_v37, %v370_v50  ;;  %v941_v44 = vsel %vm940_vm4, %v928_v32, 0.0 }
 0x1d3   :  { %v949_v56 = vsel %vm940_vm4, %v933_v36, 0.0 }
 0x1d4   :  { %v942_v52 = vsel %vm940_vm4, %v929_v39, 0.0  ;;  %v932_v53 = vmul.f32 %v788_v41, %v528_v38  ;;  %v1239_v45 = vpop.f32.mrb[16].mxu0  ;;  %v946_v0 = vsel %vm940_vm4, %v931_v40, 0.0  ;;  %v1310_v38 = vmov -1.0  }
 0x1d5   :  { %v943_v60 = vadd.f32 %v942_v52, %v941_v44  ;;  %v858_v62 = vadd.f32 %v1239_v45, %v390_v47  ;;  %v849_v63 = vpop.f32.mrb[17].mxu0 }
 0x1d6   :  { %v947_v50 = vsel %vm940_vm4, %v932_v53, 0.0  ;;  %v850_v55 = vadd.f32 %v849_v63, %v1574_v59  ;;  %v1240_v1 = vpop.f32.mrb[18].mxu0  ;;  %v1245_v2 = vpop.f32.mrb[16].mxu1 }
 0x1d7   :  { %v945_v3 = vadd.f32 %v944_v46, %v943_v60  ;;  %v948_v4 = vadd.f32 %v947_v50, %v946_v0  ;;  %v936_v6 = vmul.f32 %v858_v62, %v598_v43  ;;  %v923_v8 = vadd.f32 %v1245_v2, %v405_v54  ;;  %v852_v9 = vpop.f32.mrb[19].mxu0  ;;  %v914_v10 = vpop.f32.mrb[17].mxu1 }
 0x1d8   :  { %v934_v11 = vmul.f32 %v850_v55, %v590_v51  ;;  %v853_v13 = vadd.f32 %v852_v9, %v1576_v61  ;;  %v915_v15 = vadd.f32 %v914_v10, %v1578_v5  ;;  %v1246_v16 = vpop.f32.mrb[18].mxu1 }
 0x1d9   :  { %v969_v18 = vand.u32 2147483647, %v945_v3  ;;  %v950_v59 = vadd.f32 %v949_v56, %v948_v4  ;;  %v917_v19 = vpop.f32.mrb[19].mxu1  ;;  %v939_v20 = vmul.f32 %v923_v8, %v663_v48  ;;  %v954_v57 = vsel %vm940_vm4, %v936_v6, 0.0 }
 0x1da   :  { %v935_v21 = vmul.f32 %v853_v13, %v593_v49  ;;  %v937_v23 = vmul.f32 %v915_v15, %v655_v17  ;;  %v951_v25 = vsel %vm940_vm4, %v934_v11, 0.0  ;;  %v918_v5 = vadd.f32 %v917_v19, %v1580_v7 }
 0x1db   :  { %1291 = vrsqrt.f32 %v969_v18  ;;  %v970_v22 = vand.u32 2147483647, %v950_v59  ;;  %v959_v58 = vsel %vm940_vm4, %v939_v20, 0.0  ;;  %vm961_vm5 = vcmp.ge.f32.partialorder %v945_v3, 0.0 }
 0x1dc   :  { %v952_v61 = vsel %vm940_vm4, %v935_v21, 0.0  ;;  %v938_v12 = vmul.f32 %v918_v5, %v658_v24  ;;  %v956_v28 = vsel %vm940_vm4, %v937_v23, 0.0  ;;  %vm975_vm6 = vcmp.eq.f32.partialorder %v969_v18, inf }
 0x1dd   :  { %1293 = vrsqrt.f32 %v970_v22  ;;  %v953_v26 = vadd.f32 %v952_v61, %v951_v25  ;;  %v978_v35 = vand.u32 2147483648, %v969_v18  ;;  %vm962_vm7 = vcmp.ge.f32.partialorder %v950_v59, 0.0 }
 0x1de   :  { %v957_v29 = vsel %vm940_vm4, %v938_v12, 0.0  ;;  %vm977_vm8 = vcmp.eq.f32.partialorder %v969_v18, 0.0  ;;  %v965_v39 = vsel %vm961_vm5, 1.0, %v1310_v38  ;;  %vm982_vm9 = vcmp.eq.f32.partialorder %v970_v22, inf }
 0x1df   :  { %v955_v27 = vadd.f32 %v954_v57, %v953_v26  ;;  %v958_v31 = vadd.f32 %v957_v29, %v956_v28  ;;  %v985_v41 = vand.u32 2147483648, %v970_v22  ;;  %vm984_vm10 = vcmp.eq.f32.partialorder %v970_v22, 0.0 }
 0x1e0   :  { %v966_v51 = vsel %vm962_vm7, 1.0, %v1310_v38 }
 0x1e1   :  { %v971_v30 = vand.u32 2147483647, %v955_v27  ;;  %v960_v14 = vadd.f32 %v959_v58, %v958_v31  ;;  %vm963_vm11 = vcmp.ge.f32.partialorder %v955_v27, 0.0 }
 0x1e2   :  { %v967_v50 = vsel %vm963_vm11, 1.0, %v1310_v38 }
 0x1e3   :  { %1295 = vrsqrt.f32 %v971_v30  ;;  %v972_v33 = vand.u32 2147483647, %v960_v14  ;;  %vm989_vm12 = vcmp.eq.f32.partialorder %v971_v30, inf  ;;  %v992_v62 = vand.u32 2147483648, %v971_v30 }
 0x1e4   :  { %vm991_vm13 = vcmp.eq.f32.partialorder %v971_v30, 0.0  ;;  %vm964_vm14 = vcmp.ge.f32.partialorder %v960_v14, 0.0 }
 0x1e5   :  { %v1292_v32 = vpop.eup %1291  ;;  %1297 = vrsqrt.f32 %v972_v33  ;;  %vm996_vm15 = vcmp.eq.f32.partialorder %v972_v33, inf  ;;  %v999_v9 = vand.u32 2147483648, %v972_v33  ;;  %vm998_vm0 = vcmp.eq.f32.partialorder %v972_v33, 0.0 }
 0x1e6   :  { %v974_v7 = vmul.f32 %v1292_v32, %v969_v18  ;;  %v968_v11 = vsel %vm964_vm14, 1.0, %v1310_v38 }
 0x1e7   :  { %v1294_v34 = vpop.eup %1293 }
 0x1e8   :  { %v976_v36 = vsel %vm975_vm6, %v969_v18, %v974_v7  ;;  %v981_v37 = vmul.f32 %v1294_v34, %v970_v22 }
 0x1e9   :  { %v979_v40 = vsel %vm977_vm8, %v978_v35, %v976_v36 }
 0x1ea   :  { %v983_v43 = vsel %vm982_vm9, %v970_v22, %v981_v37  ;;  %v1603_v47 = vmul.f32 %v979_v40, %v965_v39 }
 0x1eb   :  { %v986_v44 = vsel %vm984_vm10, %v985_v41, %v983_v43 }
 0x1ec   :  { %v1605_v52 = vmul.f32 %v986_v44, %v966_v51  ;;  %v1005_v53 = vmul.f32 %v1603_v47, %v1603_v47  ;;  %v1051_v44 = vld [vmem:[%s1631_s5] sm:$0xf] }
 0x1ed   :  { %v1296_v45 = vpop.eup %1295 }
 0x1ee   :  { %v1006_v54 = vmul.f32 %v1605_v52, %v1605_v52  ;;  %v1009_v48 = vsel %vm940_vm4, %v1005_v53, 0.0  ;;  %v988_v49 = vmul.f32 %v1296_v45, %v971_v30  ;;  %v1056_v53 = vpop.permute.xlu0 %1055 }
 0x1ef   :  { %v1010_v60 = vrot.slane %v1009_v48, 4  ;;  %v1298_v0 = vpop.eup %1297 }
 0x1f0   :  { %v1016_v63 = vsel %vm940_vm4, %v1006_v54, 0.0  ;;  %v990_v46 = vsel %vm989_vm12, %v971_v30, %v988_v49  ;;  %v995_v3 = vmul.f32 %v1298_v0, %v972_v33 }
 0x1f1   :  { %v1011_v55 = vadd.f32 %v1010_v60, %v1009_v48  ;;  %v1017_v1 = vrot.slane %v1016_v63, 4  ;;  %v993_v2 = vsel %vm991_vm13, %v992_v62, %v990_v46 }
 0x1f2   :  { %v1003_v4 = vmul.f32 %v993_v2, %v967_v50  ;;  %v997_v10 = vsel %vm996_vm15, %v972_v33, %v995_v3 }
 0x1f3   :  { %v1012_v6 = vrot.slane %v1011_v55, 2  ;;  %v1018_v8 = vadd.f32 %v1017_v1, %v1016_v63  ;;  %v1000_v16 = vsel %vm998_vm0, %v999_v9, %v997_v10 }
 0x1f4   :  { %v1007_v56 = vmul.f32 %v1003_v4, %v1003_v4  ;;  %v1004_v17 = vmul.f32 %v1000_v16, %v968_v11 }
 0x1f5   :  { %v1013_v13 = vadd.f32 %v1012_v6, %v1011_v55  ;;  %v1019_v15 = vrot.slane %v1018_v8, 2 }
 0x1f6   :  { %v1023_v18 = vsel %vm940_vm4, %v1007_v56, 0.0  ;;  %v1008_v21 = vmul.f32 %v1004_v17, %v1004_v17 }
 0x1f7   :  { %v1014_v59 = vrot.slane %v1013_v13, 1  ;;  %v1020_v19 = vadd.f32 %v1019_v15, %v1018_v8  ;;  %v1024_v20 = vrot.slane %v1023_v18, 4 }
 0x1f8   :  { %v1030_v25 = vsel %vm940_vm4, %v1008_v21, 0.0 }
 0x1f9   :  { %v1015_v22 = vadd.f32 %v1014_v59, %v1013_v13  ;;  %v1021_v23 = vrot.slane %v1020_v19, 1  ;;  %v1025_v24 = vadd.f32 %v1024_v20, %v1023_v18  ;;  %v1031_v57 = vrot.slane %v1030_v25, 4 }
 0x1fb   :  { %v1022_v61 = vadd.f32 %v1021_v23, %v1020_v19  ;;  %v1037_v5 = vmax.f32 %v1015_v22, 1e-24  ;;  %v1026_v26 = vrot.slane %v1025_v24, 2  ;;  %v1032_v28 = vadd.f32 %v1031_v57, %v1030_v25 }
 0x1fd   :  { %v1038_v12 = vmax.f32 %v1022_v61, 1e-24  ;;  %1299 = vrsqrt.f32 %v1037_v5  ;;  %v1027_v27 = vadd.f32 %v1026_v26, %v1025_v24  ;;  %v1033_v30 = vrot.slane %v1032_v28, 2 }
 0x1ff   :  { %1301 = vrsqrt.f32 %v1038_v12  ;;  %v1028_v29 = vrot.slane %v1027_v27, 1  ;;  %v1034_v58 = vadd.f32 %v1033_v30, %v1032_v28 }
 0x201   :  { %v1029_v31 = vadd.f32 %v1028_v29, %v1027_v27  ;;  %v1035_v14 = vrot.slane %v1034_v58, 1 }
 0x203   :  { %v1039_v32 = vmax.f32 %v1029_v31, 1e-24  ;;  %v1036_v33 = vadd.f32 %v1035_v14, %v1034_v58 }
 0x205   :  { %v1040_v34 = vmax.f32 %v1036_v33, 1e-24  ;;  %1303 = vrsqrt.f32 %v1039_v32 }
 0x207   :  { %v1300_v7 = vpop.eup %1299  ;;  %1305 = vrsqrt.f32 %v1040_v34 }
 0x208   :  { %v1045_v36 = vmul.f32 %v1300_v7, %v1603_v47 }
 0x209   :  { %v1302_v35 = vpop.eup %1301 }
 0x20a   :  { %v1046_v37 = vmul.f32 %v1302_v35, %v1605_v52 }
 0x20c   :  { %v1049_v38 = vpack.c.bf16 %v1046_v37, %v1045_v36 }
 0x20e   :  { %1248 = vmatpush3.bf16.msra.mxu0 %v1049_v38 }
 0x20f   :  { %1249 = vmatprep.subr.bf16.mxu0 %v1308_v42  ;;  %v1304_v39 = vpop.eup %1303 }
 0x210   :  { %v1047_v41 = vmul.f32 %v1304_v39, %v1003_v4 }
 0x211   :  { %v1306_v40 = vpop.eup %1305 }
 0x212   :  { %v1048_v43 = vmul.f32 %v1306_v40, %v1004_v17 }
 0x214   :  { %v1050_v51 = vpack.c.bf16 %v1048_v43, %v1047_v41 }
 0x216   :  { %1250 = vmatpush3.bf16.msra.mxu0 %v1050_v51 }
 0x219   :  { %1252 = vmatmul.mubr.msk.bf16.vlgmr.msra.gmra.mrb[20].mxu0 %vm1058_vm1, %v1051_v44 }
 0x2ec   :  { %v1096_v47 = vpop.f32.mrb[20].mxu0 }
 0x2ed   :  { %v1097_v45 = vadd.f32 %v1096_v47, %v1056_v53  ;;  %v1253_v52 = vpop.f32.mrb[21].mxu0 }
 0x2ee   :  { %v1099_v54 = vpop.f32.mrb[22].mxu0 }
 0x2ef   :  { %1102 = vst.msk [vmem:[%s1632_s7] sm:$0xff] %vm940_vm4, %v1097_v45  ;;  %v1254_v42 = vpop.f32.mrb[23].mxu0 }

</bundles_post_ra>
